<compile_context>
chip_gen: v6e
topology: v6e:2x2x1
jax: 0.10.0
libtpu: 0.0.40
codegen_flags: <defaults>
</compile_context>

<pallas_src>
import jax
import jax.numpy as jnp
from jax.experimental import pallas as pl
from jax.experimental.pallas import tpu as pltpu

TEMPERATURE = 0.2  # softmax temperature used by FrameMixup


# ----------------------------------------------------------------------------
# Kernels
# ----------------------------------------------------------------------------
def _softmax_kernel(logits_ref, w_ref):
    """Row-softmax of a (tm_s, T) slab of the mixing logits, in f32."""
    logits = logits_ref[...].astype(jnp.float32) * (1.0 / TEMPERATURE)
    m = jnp.max(logits, axis=-1, keepdims=True)
    e = jnp.exp(logits - m)
    w_ref[...] = (e / jnp.sum(e, axis=-1, keepdims=True)).astype(w_ref.dtype)


def _mix_kernel(w_ref, x_ref, o_ref):
    """One grid step: (tm, T) @ (T, tf) frame mixing on the MXU, f32 accum."""
    # TODO(synk): for MXU-bound (very large T) shapes, feed bf16 operands with
    # f32 accumulation after a numerics sign-off; kept f32 while HBM-bound.
    x = x_ref[0].astype(jnp.float32)
    acc = jnp.dot(w_ref[...], x, preferred_element_type=jnp.float32)
    o_ref[0] = acc.astype(o_ref.dtype)


# ----------------------------------------------------------------------------
# Tiling / VMEM budgeting
# ----------------------------------------------------------------------------
def _round_up(x, m):
    return ((x + m - 1) // m) * m


def _vmem_caps():
    """(working-set budget, vmem_limit ceiling) in bytes for this chip.

    v7x: 64 MiB physical -> ~32 MiB budget; v5e/v6e: 128 MiB -> ~56 MiB.
    Falls back to conservative values if the hardware query is unavailable.
    """
    try:
        cap = int(pltpu.get_tpu_info().vmem_capacity_bytes)
    except Exception:
        cap = 64 * 1024 * 1024
    budget = max(16 * 1024 * 1024, min(cap // 2, 56 * 1024 * 1024))
    ceiling = max(32 * 1024 * 1024, cap - 8 * 1024 * 1024)
    return budget, ceiling


def _pick_tiles(B, T, F, x_itemsize, budget):
    """Choose (tm, m_tiles, tf, f_tiles) for the mixing matmul."""
    # --- W row tile: keep the resident double-buffered f32 W block under
    # ~1/3 of the budget so the x/out pipeline gets the rest (only kicks in
    # at large T, primarily a v7x concern with its 64 MiB VMEM).
    w_cap = budget // 3
    if 2 * T * T * 4 <= w_cap:
        tm = T
    else:
        tm = max(128, (w_cap // (2 * T * 4) // 128) * 128)
        tm = min(tm, T)
    m_tiles = pl.cdiv(T, tm)

    # --- Lane (F) tile: bytes-targeted (~8 MiB per input block), a multiple
    # of 128, or simply the full F when F is small (lane-dense either way).
    if F <= 256:
        tf = F
    else:
        avail = max(budget - 2 * tm * T * 4, 8 * 1024 * 1024)
        per_lane = 2 * (T + tm) * x_itemsize          # dbl-buffered in + out
        fit_tf = max(128, (avail // per_lane // 128) * 128)
        tgt_tf = max(128, ((8 * 1024 * 1024) // (T * x_itemsize) // 128) * 128)
        tf = min(fit_tf, tgt_tf)
        if tf >= F:
            tf = F
    f_tiles = pl.cdiv(F, tf)

    # --- v7x balance: with 2 TensorCores sharing a parallel grid, avoid an
    # odd total step count when we are already splitting (never introduce a
    # split just for this — v5e has a single core).
    total = m_tiles * B * f_tiles
    if f_tiles > 1 and total % 2 == 1:
        tf2 = max(128, _round_up(pl.cdiv(F, f_tiles + 1), 128))
        if tf2 < F and (m_tiles * B * pl.cdiv(F, tf2)) % 2 == 0:
            tf = tf2
            f_tiles = pl.cdiv(F, tf)

    return tm, m_tiles, tf, f_tiles


# ----------------------------------------------------------------------------
# Wrapper
# ----------------------------------------------------------------------------
@jax.jit
def fma_forward(data: jax.Array, mix_logits: jax.Array) -> jax.Array:
    """FMA.forward(data): data (B, T, F) -> (B, T, F)."""
    B, T, F = data.shape
    assert mix_logits.shape == (T, T)

    budget, ceiling = _vmem_caps()

    # --- hoisted, row-tiled softmax of the (T, T) logits (exactly once) -----
    tm_s = T if T <= 256 else 256
    sm_need = 2 * tm_s * T * (mix_logits.dtype.itemsize + 4)
    sm_limit = int(min(max(sm_need + (4 << 20), 16 << 20), ceiling))
    w = pl.pallas_call(
        _softmax_kernel,
        out_shape=jax.ShapeDtypeStruct((T, T), jnp.float32),
        grid_spec=pltpu.PrefetchScalarGridSpec(
            num_scalar_prefetch=0,
            grid=(pl.cdiv(T, tm_s),),
            in_specs=[pl.BlockSpec((tm_s, T), lambda i: (i, 0))],
            out_specs=pl.BlockSpec((tm_s, T), lambda i: (i, 0)),
        ),
        compiler_params=pltpu.CompilerParams(
            dimension_semantics=("parallel",),
            vmem_limit_bytes=sm_limit,
        ),
    )(mix_logits)

    # --- frame mixing on the native (B, T, F) layout: no transposes ---------
    tm, m_tiles, tf, f_tiles = _pick_tiles(B, T, F, data.dtype.itemsize, budget)

    mix_need = (2 * tm * T * 4
                + 2 * T * tf * data.dtype.itemsize
                + 2 * tm * tf * data.dtype.itemsize)
    mix_limit = int(min(max(mix_need + (4 << 20), 16 << 20), ceiling))

    out = pl.pallas_call(
        _mix_kernel,
        out_shape=jax.ShapeDtypeStruct((B, T, F), data.dtype),
        grid_spec=pltpu.PrefetchScalarGridSpec(
            num_scalar_prefetch=0,
            grid=(m_tiles, B, f_tiles),
            in_specs=[
                # Mixing weights: block index constant over (b, j) -> only
                # re-fetched when the M tile changes (once if m_tiles == 1).
                pl.BlockSpec((tm, T), lambda m, b, j: (m, 0)),
                # One batch element x lane-chunk of the spectrogram per step.
                pl.BlockSpec((1, T, tf), lambda m, b, j: (b, 0, j)),
            ],
            out_specs=pl.BlockSpec((1, tm, tf), lambda m, b, j: (b, m, j)),
        ),
        compiler_params=pltpu.CompilerParams(
            dimension_semantics=("parallel", "parallel", "parallel"),
            vmem_limit_bytes=mix_limit,
        ),
    )(w, data)

    return out


def fma_reference(data, mix_logits):
    w = jax.nn.softmax(mix_logits.astype(jnp.float32) / TEMPERATURE, axis=-1)
    return jnp.einsum("tk,bkf->btf", w, data.astype(jnp.float32)).astype(data.dtype)


if __name__ == "__main__":
    # Small, deterministic example shapes consistent with FMA(in_t_dim, in_f_dim):
    #   in_t_dim = 16 time frames, in_f_dim = 32 mel bins, batch = 2.
    B, T, F = 2, 16, 32

    key = jax.random.PRNGKey(0)
    k_data, k_param = jax.random.split(key)

    data = jax.random.normal(k_data, (B, T, F), dtype=jnp.float32)
    # Deterministic parameter init (FrameMixup's learnable (T, T) mixing
    # logits): small noise around an identity bias so initial mixing stays
    # near-identity.
    mix_logits = (0.02 * jax.random.normal(k_param, (T, T), dtype=jnp.float32)
                  + jnp.eye(T, dtype=jnp.float32))

    out = fma_forward(data, mix_logits)
    out = jax.block_until_ready(out)

    ref = fma_reference(data, mix_logits)
    assert out.shape == (B, T, F)
    assert jnp.allclose(out, ref, atol=1e-4, rtol=1e-4), "mismatch vs JAX reference"

    print("KERNEL_OK")
</pallas_src>

<mosaic_0001>
module attributes {stable_mosaic.version = 11 : i64} {
  func.func @_mix_kernel(%arg0: i32, %arg1: i32, %arg2: i32, %arg3: memref<16x16xf32, #tpu.memory_space<vmem>>, %arg4: memref<1x16x32xf32, #tpu.memory_space<vmem>>, %arg5: memref<1x16x32xf32, #tpu.memory_space<vmem>>) attributes {dimension_semantics = [#tpu.dimension_semantics<parallel>, #tpu.dimension_semantics<parallel>, #tpu.dimension_semantics<parallel>], iteration_bounds = array<i64: 1, 2, 1>, scalar_prefetch = 0 : i64, scratch_operands = 0 : i64, tpu.core_type = #tpu.core_type<tc>, window_params = [{transform_indices = @transform_0, window_bounds = array<i64: 16, 16>}, {transform_indices = @transform_1, window_bounds = array<i64: 1, 16, 32>}, {transform_indices = @transform_2, window_bounds = array<i64: 1, 16, 32>}]} {
    %c0 = arith.constant 0 : index
    %c0_0 = arith.constant 0 : index
    %c0_1 = arith.constant 0 : index
    %0 = vector.load %arg4[%c0, %c0_0, %c0_1] : memref<1x16x32xf32, #tpu.memory_space<vmem>>, vector<1x16x32xf32>
    %1 = vector.shape_cast %0 : vector<1x16x32xf32> to vector<16x32xf32>
    %c0_2 = arith.constant 0 : index
    %c0_3 = arith.constant 0 : index
    %2 = vector.load %arg3[%c0_2, %c0_3] : memref<16x16xf32, #tpu.memory_space<vmem>>, vector<16x16xf32>
    %cst = arith.constant dense<0.000000e+00> : vector<16x32xf32>
    %3 = tpu.matmul %2, %1, %cst {dimension_numbers = #tpu.dot_dimension_numbers<[1], [0], [0], [1], [0, 0, 1, 1], [], []>} : vector<16x16xf32>, vector<16x32xf32>, vector<16x32xf32> -> vector<16x32xf32>
    %c0_4 = arith.constant 0 : index
    %c0_5 = arith.constant 0 : index
    %c0_6 = arith.constant 0 : index
    %4 = vector.load %arg5[%c0_4, %c0_5, %c0_6] : memref<1x16x32xf32, #tpu.memory_space<vmem>>, vector<1x16x32xf32>
    %5 = vector.shape_cast %4 : vector<1x16x32xf32> to vector<16x32xf32>
    %6 = vector.shape_cast %3 : vector<16x32xf32> to vector<1x16x32xf32>
    tpu.vector_store %arg5[%c0_4, %c0_5, %c0_6], %6 {strides = array<i32>} : memref<1x16x32xf32, #tpu.memory_space<vmem>>, vector<1x16x32xf32>,
    return
  }
  func.func @transform_0(%arg0: i32, %arg1: i32, %arg2: i32) -> (i32, i32) {
    %c0_i32 = arith.constant 0 : i32
    %c0_i32_0 = arith.constant 0 : i32
    return %arg0, %c0_i32 : i32, i32
  }
  func.func @transform_1(%arg0: i32, %arg1: i32, %arg2: i32) -> (i32, i32, i32) {
    %c0_i32 = arith.constant 0 : i32
    %c0_i32_0 = arith.constant 0 : i32
    return %arg1, %c0_i32, %arg2 : i32, i32, i32
  }
  func.func @transform_2(%arg0: i32, %arg1: i32, %arg2: i32) -> (i32, i32, i32) {
    %c0_i32 = arith.constant 0 : i32
    return %arg1, %arg0, %arg2 : i32, i32, i32
  }
}

module attributes {stable_mosaic.version = 11 : i64} {
  func.func @_softmax_kernel(%arg0: i32, %arg1: memref<16x16xf32, #tpu.memory_space<vmem>>, %arg2: memref<16x16xf32, #tpu.memory_space<vmem>>) attributes {dimension_semantics = [#tpu.dimension_semantics<parallel>], iteration_bounds = array<i64: 1>, scalar_prefetch = 0 : i64, scratch_operands = 0 : i64, tpu.core_type = #tpu.core_type<tc>, window_params = [{transform_indices = @transform_0, window_bounds = array<i64: 16, 16>}, {transform_indices = @transform_1, window_bounds = array<i64: 16, 16>}]} {
    %c0 = arith.constant 0 : index
    %c0_0 = arith.constant 0 : index
    %0 = vector.load %arg1[%c0, %c0_0] : memref<16x16xf32, #tpu.memory_space<vmem>>, vector<16x16xf32>
    %cst = arith.constant 5.000000e+00 : f32
    %1 = vector.broadcast %cst : f32 to vector<16x16xf32>
    %2 = arith.mulf %0, %1 : vector<16x16xf32>
    %cst_1 = arith.constant dense<0xFF800000> : vector<16xf32>
    %3 = vector.multi_reduction <maximumf>, %2, %cst_1 [1] : vector<16x16xf32> to vector<16xf32>
    %4 = vector.shape_cast %3 : vector<16xf32> to vector<16x1xf32>
    %5 = vector.broadcast %4 : vector<16x1xf32> to vector<16x16xf32>
    %6 = arith.subf %2, %5 : vector<16x16xf32>
    %7 = math.exp %6 : vector<16x16xf32>
    %cst_2 = arith.constant dense<0.000000e+00> : vector<16xf32>
    %8 = vector.multi_reduction <add>, %7, %cst_2 [1] : vector<16x16xf32> to vector<16xf32>
    %9 = vector.shape_cast %8 : vector<16xf32> to vector<16x1xf32>
    %10 = vector.broadcast %9 : vector<16x1xf32> to vector<16x16xf32>
    %11 = arith.divf %7, %10 : vector<16x16xf32>
    %c0_3 = arith.constant 0 : index
    %c0_4 = arith.constant 0 : index
    %12 = vector.load %arg2[%c0_3, %c0_4] : memref<16x16xf32, #tpu.memory_space<vmem>>, vector<16x16xf32>
    tpu.vector_store %arg2[%c0_3, %c0_4], %11 {strides = array<i32>} : memref<16x16xf32, #tpu.memory_space<vmem>>, vector<16x16xf32>,
    return
  }
  func.func @transform_0(%arg0: i32) -> (i32, i32) {
    %c0_i32 = arith.constant 0 : i32
    %c0_i32_0 = arith.constant 0 : i32
    return %arg0, %c0_i32 : i32, i32
  }
  func.func @transform_1(%arg0: i32) -> (i32, i32) {
    %c0_i32 = arith.constant 0 : i32
    %c0_i32_0 = arith.constant 0 : i32
    return %arg0, %c0_i32 : i32, i32
  }
}

</mosaic_0001>

<bundles_post_ra>
// kernel: fma_forward.2
= control target key start
LH: loop header
LB: loop body
LE: loop exit
PB: predicated region body
PF: predicated region fallthrough
CT: control target
= control target key end

     0   :  { %6 = vsyncpa [#allocation3], 0  ;;  %s89_s6 = smov [#allocation2]   ;;  %s117_s0 = inlined_call_operand.hbm [shape: f32[16,16], index: 0, kind: input, shape index: {}]   ;;  %s118_s1 = inlined_call_operand.vmem [shape: f32[16,16], index: 1, kind: output, shape index: {}]  }
   0x1   :  { %s12_s7 = sshll.u32 %s89_s6, 4  ;;  %s13_s7 = int_to_ptr.vmem [resolvable:$true] %s12_s7 }
   0x2   :  { %s75_s8 = scalar_lea.vmem %s13_s7, 256  ;;  %p80_p1 = scmp.lt.s32.totalorder %s13_s7, %s13_s7 }
   0x3   :  { %p76_p0 = scmp.ne.s32.totalorder %s13_s7, %s75_s8  ;;  %p81_p2 = scmp.lt.s32.totalorder %s75_s8, %s75_s8 }
   0x5   :  { %p82_p3 = por %p81_p2, %p80_p1 }
   0x7   :  { %p83_p4 = pnand %p82_p3, %p76_p0 }
   0x9   :  { %86 = shalt.err (!%p83_p4)
}
   0xa   :  { %s90_s9 = smov 128   ;;  %s91_s10 = smov 8  }
   0xb   :  { %18 = dma.hbm_to_vmem [thread:$0]  %s117_s0, 256, %s13_s7, [#allocation3], %s90_s9, %s90_s9, %s91_s10  }
   0xc   :  { %87 = dma.done.wait [#allocation3], 256  }
   0xd   :  { %88 = vsyncadd [#allocation3], 4294967040  ;;  %v22_v0 = vld [vmem:[#allocation2] sm:$0xff]  ;;  %vm26_vm0 = vcmask 130048   ;;  %v23_v1 = vld [vmem:[#allocation2 + $0x8] sm:$0xff] }
   0xe   :  { %v24_v2 = vmul.f32 5.0, %v22_v0  ;;  %v25_v3 = vmul.f32 5.0, %v23_v1 }
  0x10   :  { %v27_v4 = vsel %vm26_vm0, %v24_v2, -inf  ;;  %v30_v5 = vsel %vm26_vm0, %v25_v3, -inf }
  0x11   :  { %28 = vmax.xlane.f32.xlu0 %v27_v4 }
  0x15   :  { %31 = vmax.xlane.f32.xlu0 %v30_v5 }
  0x9a   :  { %v29_v6 = vpop.xlane.xlu0 %28 }
  0x9b   :  { %v33_v7 = vsub.f32 %v24_v2, %v29_v6 }
  0x9d   :  { %v35_v8 = vmul.f32 1.442695, %v33_v7 }
  0x9e   :  { %v32_v9 = vpop.xlane.xlu0 %31 }
  0x9f   :  { %59 = vpow2.f32 %v35_v8  ;;  %v34_v10 = vsub.f32 %v25_v3, %v32_v9 }
  0xa1   :  { %v37_v11 = vmul.f32 1.442695, %v34_v10 }
  0xa3   :  { %61 = vpow2.f32 %v37_v11 }
  0xac   :  { %v60_v12 = vpop.eup %59 }
  0xad   :  { %v39_v13 = vsel %vm26_vm0, %v60_v12, 0.0 }
  0xae   :  { %40 = vadd.xlane.f32.xlu1 %v39_v13 }
  0xb0   :  { %v62_v14 = vpop.eup %61 }
  0xb1   :  { %v42_v15 = vsel %vm26_vm0, %v62_v14, 0.0 }
  0xb2   :  { %43 = vadd.xlane.f32.xlu1 %v42_v15 }
 0x137   :  { %v41_v16 = vpop.xlane.xlu1 %40 }
 0x138   :  { %63 = vrcp.f32 %v41_v16 }
 0x13b   :  { %v44_v17 = vpop.xlane.xlu1 %43 }
 0x13c   :  { %65 = vrcp.f32 %v44_v17 }
 0x145   :  { %v64_v18 = vpop.eup %63 }
 0x146   :  { %v46_v19 = vmul.f32 %v64_v18, %v60_v12 }
 0x148   :  { %49 = vst.msk [vmem:[%s118_s1] sm:$0xff] %vm26_vm0, %v46_v19 }
 0x149   :  { %v66_v20 = vpop.eup %65 }
 0x14a   :  { %v48_v21 = vmul.f32 %v66_v20, %v62_v14 }
 0x14c   :  { %50 = vst.msk [vmem:[%s118_s1 + $0x8] sm:$0xff] %vm26_vm0, %v48_v21 }
 0x14d   :  { %55 = vsyncpa [#allocation3], 1 }

// kernel: fma_forward.3
= control target key start
LH: loop header
LB: loop body
LE: loop exit
PB: predicated region body
PF: predicated region fallthrough
CT: control target
= control target key end

     0   :  { %7 = vsyncpa [#allocation3], 0  ;;  %s705_s0 = inlined_call_operand.vmem [shape: f32[16,16], index: 0, kind: input, shape index: {}]   ;;  %s706_s1 = inlined_call_operand.vmem [shape: f32[2,16,32], index: 1, kind: input, shape index: {}]   ;;  %s707_s2 = inlined_call_operand.hbm [shape: f32[2,16,32], index: 2, kind: output, shape index: {}]  }
   0x1   :  { %9 = vsyncpa [#allocation3 + $0x1], 0  ;;  %s585_s9 = smov 0   ;;  %s587_s10 = smov 0  }
   0x2   :  { %s589_s11 = smov 0   ;;  %s591_s12 = smov 0  }
   0x3   :  { %s593_s13 = smov 0   ;;  %s595_s14 = smov 0  }
   0x4 LB: > { %s403_s15 = sadd.s32 4294967295, %s565_s14   ;;  %s404_s16 = sadd.s32 4294967294, %s565_s14   ;;  %s565_s14 = sphi %s595_s14, %s15_s14   ;;  %s561_s13 = sphi %s593_s13, %s714_s13   ;;  %s557_s12 = sphi %s591_s12, %s713_s12   ;;  %s553_s11 = sphi %s589_s11, %s712_s11   ;;  %s549_s10 = sphi %s587_s10, %s711_s10   ;;  %s545_s9 = sphi %s585_s9, %s710_s9  }
   0x5   : > { %s30_s17 = sadd.s32 1, %s561_s13  ;;  %s99_s18 = sadd.s32 1, %s553_s11 }
   0x6   : > { %p32_p0 = scmp.ge.s32.totalorder %s30_s17, 2  ;;  %p109_p1 = scmp.ne.s32.totalorder %s553_s11, %s549_s10 }
   0x7   : > { %p110_p2 = scmp.eq.s32.totalorder %s403_s15, 1  ;;  %p115_p3 = scmp.ne.s32.totalorder %s549_s10, %s545_s9 }
   0x8   : > { %s716_s17 = smov (%p32_p0, %s30_s17), 0  ;;  %p116_p5 = scmp.eq.s32.totalorder %s404_s16, 1 }
   0x9   : > { %p625_p4 = por %p110_p2, %p109_p1  ;;  %s92_s20 = ssub.s32 %s561_s13, %s716_s17 }
   0xa   : > { %p408_p6 = scmp.ge.s32.totalorder %s565_s14, 1  ;;  %p97_p7 = scmp.eq.s32.totalorder %s92_s20, 0 }
   0xb   : > { %p632_p8 = por %p116_p5, %p115_p3  ;;  %p154_p9 = scmp.lt.s32.totalorder %s565_s14, 3 }
   0xc   : > { %s638_s22 = scalar_select %p97_p7, %s553_s11, %s99_s18  }
   0xd   : > { %p155_p10 = pnand %p408_p6, %p154_p9 }
   0xe   : > { %p190_p11 = scmp.lt.s32.totalorder (!%p155_p10), %s557_s12, 1  ;;  %s181_s4 = sand.u32 (!%p155_p10), 1, %s549_s10  }
   0xf   : > { %158 = sbr.rel (%p155_p10) target bundleno = 238 (0xee), region = 28  ;;  %s409_s5 = sshll.u32 (!%p155_p10), %s181_s4, 4 }
  0x10   : > { %s183_s6 = scalar_lea.vmem (!%p155_p10), [#allocation2], %s409_s5  ;;  %s420_s8 = sshll.u32 (!%p155_p10), %s557_s12, 8 }
  0x11   : > { %s305_s7 = sshll.u32 (!%p155_p10), %s183_s6, 4  ;;  %s658_s18 = scalar_lea.hbm (!%p155_p10), %s707_s2, %s420_s8  ;;  %s653_s7 = int_to_ptr.vmem [resolvable:$true] %s305_s7 }
  0x12   : > { %s660_s20 = scalar_lea.sflag (!%p155_p10), [#allocation3], %s181_s4  ;;  %s489_s23 = scalar_lea.vmem (!%p155_p10), %s653_s7, 256 }
  0x13   : > { %p490_p12 = scmp.ne.s32.totalorder (!%p155_p10), %s653_s7, %s489_s23 }
  0x14   : > { %v201_v0 = vld [vmem:[%s705_s0] sm:$0xff]  ;;  %vm203_vm0 = vcmask 130048   ;;  %s191_s25 = scalar_select %p190_p11, %s557_s12, 1  ;;  %v202_v3 = vld [vmem:[%s705_s0 + $0x8] sm:$0xff]  ;;  %vm285_vm1 = vcmask 261120  }
  0x15   : > { %429 = vmatprep.mubr.msk.f32.mxu0 %vm203_vm0, %v201_v0  ;;  %p491_p13 = pnand %p490_p12, %p625_p4  ;;  %s567_s12 = smov [#allocation2]  }
  0x16   : > { %s419_s26 = sshll.u32 %s191_s25, 4  ;;  %s493_s24 = sshll.u32 %s567_s12, 4  ;;  %s494_s24 = int_to_ptr.vmem [resolvable:$false] %s493_s24 }
  0x17   : > { %s197_s29 = scalar_lea.vmem %s706_s1, %s419_s26  ;;  %p492_p0 = pneg %p491_p13 }
  0x18   : > { %v200_v1 = vld [vmem:[%s197_s29 + $0x8] sm:$0xff]  ;;  %v199_v2 = vld [vmem:[%s197_s29] sm:$0xff]  ;;  %s495_s25 = scalar_lea.vmem %s494_s24, 512  ;;  %p496_p1 = scmp.lt.s32.totalorder %s653_s7, %s494_s24 }
  0x19   : > { %425 = vmatprep.subr.mxu0 %v200_v1  ;;  %p497_p2 = scmp.lt.s32.totalorder %s495_s25, %s489_s23 }
  0x1a   : > { %426 = vmatpush3.msra.mxu0 %v200_v1 }
  0x1b   : > { %427 = vmatprep.subr.mxu0 %v199_v2  ;;  %p498_p3 = por %p497_p2, %p496_p1 }
  0x1c   : > { %428 = vmatpush3.msra.mxu0 %v199_v2 }
  0x1d   : > { %430 = vmatmul.mubr.msk.f32.vlgmr.msra.gmra.mxu0 %vm203_vm0, %v202_v3  ;;  %p499_p5 = pnand %p498_p3, %p492_p0 }
  0xdd   : > { %v431_v4 = vpop.f32.mrf.mxu0 }
  0xde   : > { %287 = vst.msk [vmem:[%s183_s6 + $0x8] sm:$0xff] %vm285_vm1, %v431_v4 }
  0xdf   : > { %v276_v5 = vpop.f32.mrf.mxu0 }
  0xe0   : > { %286 = vst.msk [vmem:[%s183_s6] sm:$0xff] %vm285_vm1, %v276_v5 }
  0xe1   : > { %502 = shalt.err (!%p499_p5)
}
  0xe2   : > { %s503_s26 = scalar_lea.hbm %s658_s18, 256  ;;  %s507_s29 = scalar_lea.hbm %s707_s2, 512 }
  0xe3   : > { %p504_p6 = scmp.ne.s32.totalorder %s658_s18, %s503_s26  ;;  %p508_p10 = scmp.lt.s32.totalorder %s658_s18, %s707_s2 }
  0xe4   : > { %p509_p11 = scmp.lt.s32.totalorder %s507_s29, %s503_s26 }
  0xe5   : > { %p505_p7 = pnand %p504_p6, %p625_p4 }
  0xe6   : > { %p510_p12 = por %p509_p11, %p508_p10 }
  0xe7   : > { %p506_p9 = pneg %p505_p7 }
  0xe9   : > { %p511_p13 = pnand %p510_p12, %p506_p9 }
  0xeb   : > { %514 = shalt.err (!%p511_p13)
}
  0xec   : > { %s568_s4 = smov 128   ;;  %s569_s5 = smov 8  }
  0xed   : > { %432 = dma.vmem_to_hbm [thread:$0]  (%p625_p4), %s653_s7, 256, %s658_s18, %s660_s20, %s568_s4, %s568_s4, %s569_s5  }
  0xee PF: > { %p438_p0 = scmp.ge.s32.totalorder %s565_s14, 2  ;;  %s320_s6 = sand.u32 1, %s545_s9  }
  0xef   : > { %s321_s8 = scalar_lea.sflag [#allocation3], %s320_s6 }
  0xf0   : > { %p435_p1 = pnand %p438_p0, %p632_p8 }
  0xf2   : > { %p436_p2 = pneg %p435_p1 }
  0xf4   : > { %540 = dma.done.wait (%p436_p2), %s321_s8, 256  }
  0xf5   : > { %542 = vsyncadd (%p436_p2), %s321_s8, 4294967040  ;;  %s15_s14 = sadd.s32 1, %s565_s14   ;;  %s710_s9 = smov %s549_s10 }
  0xf6   : > { %p12_p3 = scmp.ge.s32.totalorder %s15_s14, 4   ;;  %s711_s10 = smov %s553_s11 }
  0xf7   : > { %s712_s11 = smov %s638_s22  ;;  %s713_s12 = smov %s561_s13 }
  0xf8   : > { %s714_s13 = smov %s716_s17  ;;  %14 = sbr.rel (!%p12_p3) target bundleno = 4 (0x4), region = 66 }
  0xfd   :  { %326 = vsyncpa [#allocation3], 1 }
  0xfe   :  { %328 = vsyncpa [#allocation3 + $0x1], 1 }

</bundles_post_ra>
